<compile_context>
chip_gen: v7x
topology: tpu7x:2x2x1
jax: 0.10.0
libtpu: 0.0.40
codegen_flags: <defaults>
</compile_context>

<pallas_src>
import jax
import jax.numpy as jnp
from jax import lax
from jax.experimental import pallas as pl
from jax.experimental.pallas import tpu as pltpu


def _dqn_kernel(x_ref, w1_ref, b1_ref, w2_ref, b2_ref, w3_ref, b3_ref, o_ref):
    # x_ref: (TB, in_size) f32 ; w*: (out_f, in_f) bf16 ; b*: (1, out_f) f32
    # Contract the feature axis of both operands (== x @ W.T), MXU f32 accumulate.
    dn = (((1,), (1,)), ((), ()))

    xb = x_ref[...].astype(jnp.bfloat16)

    # fc1 + ReLU -> (TB, 64)
    h1 = lax.dot_general(xb, w1_ref[...], dn, preferred_element_type=jnp.float32)
    h1 = jnp.maximum(h1 + b1_ref[...], 0.0).astype(jnp.bfloat16)

    # fc2 + ReLU -> (TB, 64)
    h2 = lax.dot_general(h1, w2_ref[...], dn, preferred_element_type=jnp.float32)
    h2 = jnp.maximum(h2 + b2_ref[...], 0.0).astype(jnp.bfloat16)

    # fc3 (no activation) -> (TB, out_size)
    h3 = lax.dot_general(h2, w3_ref[...], dn, preferred_element_type=jnp.float32)
    o_ref[...] = (h3 + b3_ref[...]).astype(o_ref.dtype)


def _round_up(x, m):
    return ((x + m - 1) // m) * m


def dqn_forward(x, params, *, block_b=2048):
    """x: (B, input_size) float32.

    params (PyTorch nn.Linear orientation):
      w1: (64, input_size)   b1: (64,)
      w2: (64, 64)           b2: (64,)
      w3: (output_size, 64)  b3: (output_size,)
    Returns (B, output_size) float32.
    """
    # Weight casts are a few KiB total (one-off, negligible); activations are
    # cast in-kernel so there are no wrapper HBM passes over x / out.
    w1 = params["w1"].astype(jnp.bfloat16)
    w2 = params["w2"].astype(jnp.bfloat16)
    w3 = params["w3"].astype(jnp.bfloat16)
    b1 = params["b1"].astype(jnp.float32).reshape(1, -1)
    b2 = params["b2"].astype(jnp.float32).reshape(1, -1)
    b3 = params["b3"].astype(jnp.float32).reshape(1, -1)

    B, in_size = x.shape
    out_size = w3.shape[0]

    # Batch tile on the sublane axis: multiple of 8, capped by block_b.
    # For larger batches, split into >=2 grid steps so the "parallel" batch
    # axis can shard across both TensorCores on v7x (no-op on v5e/v6e).
    TB = min(block_b, max(8, _round_up(B, 8)))
    if B > 256:
        TB = min(TB, _round_up(pl.cdiv(B, 2), 8))
    TB = _round_up(TB, 8)
    grid = (pl.cdiv(B, TB),)  # ragged final block handled by Pallas (rows independent)

    resident = lambda a: pl.BlockSpec(a.shape, lambda i: (0,) * a.ndim)

    out = pl.pallas_call(
        _dqn_kernel,
        out_shape=jax.ShapeDtypeStruct((B, out_size), jnp.float32),
        grid=grid,
        in_specs=[
            pl.BlockSpec((TB, in_size), lambda i: (i, 0)),  # streamed x tile
            resident(w1), resident(b1),                     # weights/biases stay in VMEM
            resident(w2), resident(b2),
            resident(w3), resident(b3),
        ],
        out_specs=pl.BlockSpec((TB, out_size), lambda i: (i, 0)),
        compiler_params=pltpu.CompilerParams(
            dimension_semantics=("parallel",),
        ),
    )(x, w1, b1, w2, b2, w3, b3)

    return out


def init_dqn_params(key, input_size, output_size, hidden=64):
    """Deterministic init mimicking nn.Linear's uniform(-1/sqrt(fan_in), 1/sqrt(fan_in)).
    Weights are in PyTorch orientation (out_features, in_features)."""
    keys = jax.random.split(key, 6)

    def linear(kw, kb, fan_in, fan_out):
        bound = 1.0 / jnp.sqrt(fan_in)
        w = jax.random.uniform(kw, (fan_out, fan_in), jnp.float32, -bound, bound)
        b = jax.random.uniform(kb, (fan_out,), jnp.float32, -bound, bound)
        return w, b

    w1, b1 = linear(keys[0], keys[1], input_size, hidden)
    w2, b2 = linear(keys[2], keys[3], hidden, hidden)
    w3, b3 = linear(keys[4], keys[5], hidden, output_size)
    return {"w1": w1, "b1": b1, "w2": w2, "b2": b2, "w3": w3, "b3": b3}


def dqn_reference(x, p):
    h1 = jnp.maximum(x @ p["w1"].T + p["b1"], 0.0)
    h2 = jnp.maximum(h1 @ p["w2"].T + p["b2"], 0.0)
    return h2 @ p["w3"].T + p["b3"]


if __name__ == "__main__":
    key = jax.random.PRNGKey(0)
    k_params, k_x = jax.random.split(key)

    batch = 8
    input_size = 16
    output_size = 4

    params = init_dqn_params(k_params, input_size, output_size)
    x = jax.random.normal(k_x, (batch, input_size), jnp.float32)

    out = dqn_forward(x, params)
    out = jax.block_until_ready(out)

    ref = dqn_reference(x, params)
    assert out.shape == (batch, output_size)
    # bf16 MXU inputs with f32 accumulation -> loose-ish tolerance vs pure-f32 reference.
    assert jnp.allclose(out, ref, atol=5e-2, rtol=5e-2), "mismatch vs JAX reference"

    # Also exercise a larger, non-tile-multiple batch (ragged final block + >=2 grid steps).
    xb = jax.random.normal(jax.random.PRNGKey(1), (300, input_size), jnp.float32)
    ob = jax.block_until_ready(dqn_forward(xb, params))
    assert ob.shape == (300, output_size)
    assert jnp.allclose(ob, dqn_reference(xb, params), atol=5e-2, rtol=5e-2)

    print("KERNEL_OK")
</pallas_src>

<mosaic_0001>
module attributes {stable_mosaic.version = 11 : i64} {
  func.func @_dqn_kernel(%arg0: i32, %arg1: memref<8x16xf32, #tpu.memory_space<vmem>>, %arg2: memref<64x16xbf16, #tpu.memory_space<vmem>>, %arg3: memref<1x64xf32, #tpu.memory_space<vmem>>, %arg4: memref<64x64xbf16, #tpu.memory_space<vmem>>, %arg5: memref<1x64xf32, #tpu.memory_space<vmem>>, %arg6: memref<4x64xbf16, #tpu.memory_space<vmem>>, %arg7: memref<1x4xf32, #tpu.memory_space<vmem>>, %arg8: memref<8x4xf32, #tpu.memory_space<vmem>>) attributes {dimension_semantics = [#tpu.dimension_semantics<parallel>], iteration_bounds = array<i64: 1>, scalar_prefetch = 0 : i64, scratch_operands = 0 : i64, tpu.core_type = #tpu.core_type<tc>, window_params = [{transform_indices = @transform_0, window_bounds = array<i64: 8, 16>}, {pipeline_mode = #tpu.pipeline_mode<synchronous>, transform_indices = @transform_1, window_bounds = array<i64: 64, 16>}, {pipeline_mode = #tpu.pipeline_mode<synchronous>, transform_indices = @transform_2, window_bounds = array<i64: 1, 64>}, {pipeline_mode = #tpu.pipeline_mode<synchronous>, transform_indices = @transform_3, window_bounds = array<i64: 64, 64>}, {pipeline_mode = #tpu.pipeline_mode<synchronous>, transform_indices = @transform_4, window_bounds = array<i64: 1, 64>}, {pipeline_mode = #tpu.pipeline_mode<synchronous>, transform_indices = @transform_5, window_bounds = array<i64: 4, 64>}, {pipeline_mode = #tpu.pipeline_mode<synchronous>, transform_indices = @transform_6, window_bounds = array<i64: 1, 4>}, {transform_indices = @transform_7, window_bounds = array<i64: 8, 4>}]} {
    %c0 = arith.constant 0 : index
    %c0_0 = arith.constant 0 : index
    %0 = vector.load %arg1[%c0, %c0_0] : memref<8x16xf32, #tpu.memory_space<vmem>>, vector<8x16xf32>
    %1 = arith.truncf %0 : vector<8x16xf32> to vector<8x16xbf16>
    %c0_1 = arith.constant 0 : index
    %c0_2 = arith.constant 0 : index
    %2 = vector.load %arg2[%c0_1, %c0_2] : memref<64x16xbf16, #tpu.memory_space<vmem>>, vector<64x16xbf16>
    %cst = arith.constant dense<0.000000e+00> : vector<8x64xf32>
    %3 = tpu.matmul %1, %2, %cst {dimension_numbers = #tpu.dot_dimension_numbers<[1], [1], [0], [0], [0, 0, 1, 0], [], []>} : vector<8x16xbf16>, vector<64x16xbf16>, vector<8x64xf32> -> vector<8x64xf32>
    %c0_3 = arith.constant 0 : index
    %c0_4 = arith.constant 0 : index
    %4 = vector.load %arg3[%c0_3, %c0_4] : memref<1x64xf32, #tpu.memory_space<vmem>>, vector<1x64xf32>
    %5 = vector.broadcast %4 : vector<1x64xf32> to vector<8x64xf32>
    %6 = arith.addf %3, %5 : vector<8x64xf32>
    %cst_5 = arith.constant 0.000000e+00 : f32
    %7 = vector.broadcast %cst_5 : f32 to vector<8x64xf32>
    %8 = arith.maximumf %6, %7 : vector<8x64xf32>
    %9 = arith.truncf %8 : vector<8x64xf32> to vector<8x64xbf16>
    %c0_6 = arith.constant 0 : index
    %c0_7 = arith.constant 0 : index
    %10 = vector.load %arg4[%c0_6, %c0_7] : memref<64x64xbf16, #tpu.memory_space<vmem>>, vector<64x64xbf16>
    %cst_8 = arith.constant dense<0.000000e+00> : vector<8x64xf32>
    %11 = tpu.matmul %9, %10, %cst_8 {dimension_numbers = #tpu.dot_dimension_numbers<[1], [1], [0], [0], [0, 0, 1, 0], [], []>} : vector<8x64xbf16>, vector<64x64xbf16>, vector<8x64xf32> -> vector<8x64xf32>
    %c0_9 = arith.constant 0 : index
    %c0_10 = arith.constant 0 : index
    %12 = vector.load %arg5[%c0_9, %c0_10] : memref<1x64xf32, #tpu.memory_space<vmem>>, vector<1x64xf32>
    %13 = vector.broadcast %12 : vector<1x64xf32> to vector<8x64xf32>
    %14 = arith.addf %11, %13 : vector<8x64xf32>
    %cst_11 = arith.constant 0.000000e+00 : f32
    %15 = vector.broadcast %cst_11 : f32 to vector<8x64xf32>
    %16 = arith.maximumf %14, %15 : vector<8x64xf32>
    %17 = arith.truncf %16 : vector<8x64xf32> to vector<8x64xbf16>
    %c0_12 = arith.constant 0 : index
    %c0_13 = arith.constant 0 : index
    %18 = vector.load %arg6[%c0_12, %c0_13] : memref<4x64xbf16, #tpu.memory_space<vmem>>, vector<4x64xbf16>
    %cst_14 = arith.constant dense<0.000000e+00> : vector<8x4xf32>
    %19 = tpu.matmul %17, %18, %cst_14 {dimension_numbers = #tpu.dot_dimension_numbers<[1], [1], [0], [0], [0, 0, 1, 0], [], []>} : vector<8x64xbf16>, vector<4x64xbf16>, vector<8x4xf32> -> vector<8x4xf32>
    %c0_15 = arith.constant 0 : index
    %c0_16 = arith.constant 0 : index
    %20 = vector.load %arg7[%c0_15, %c0_16] : memref<1x4xf32, #tpu.memory_space<vmem>>, vector<1x4xf32>
    %21 = vector.broadcast %20 : vector<1x4xf32> to vector<8x4xf32>
    %22 = arith.addf %19, %21 : vector<8x4xf32>
    %c0_17 = arith.constant 0 : index
    %c0_18 = arith.constant 0 : index
    %23 = vector.load %arg8[%c0_17, %c0_18] : memref<8x4xf32, #tpu.memory_space<vmem>>, vector<8x4xf32>
    tpu.vector_store %arg8[%c0_17, %c0_18], %22 {strides = array<i32>} : memref<8x4xf32, #tpu.memory_space<vmem>>, vector<8x4xf32>,
    return
  }
  func.func @transform_0(%arg0: i32) -> (i32, i32) {
    %c0_i32 = arith.constant 0 : i32
    %c0_i32_0 = arith.constant 0 : i32
    return %arg0, %c0_i32 : i32, i32
  }
  func.func @transform_1(%arg0: i32) -> (i32, i32) {
    %c0_i32 = arith.constant 0 : i32
    %c0_i32_0 = arith.constant 0 : i32
    %c0_i32_1 = arith.constant 0 : i32
    return %c0_i32, %c0_i32_0 : i32, i32
  }
  func.func @transform_2(%arg0: i32) -> (i32, i32) {
    %c0_i32 = arith.constant 0 : i32
    %c0_i32_0 = arith.constant 0 : i32
    %c0_i32_1 = arith.constant 0 : i32
    return %c0_i32, %c0_i32_0 : i32, i32
  }
  func.func @transform_3(%arg0: i32) -> (i32, i32) {
    %c0_i32 = arith.constant 0 : i32
    %c0_i32_0 = arith.constant 0 : i32
    %c0_i32_1 = arith.constant 0 : i32
    return %c0_i32, %c0_i32_0 : i32, i32
  }
  func.func @transform_4(%arg0: i32) -> (i32, i32) {
    %c0_i32 = arith.constant 0 : i32
    %c0_i32_0 = arith.constant 0 : i32
    %c0_i32_1 = arith.constant 0 : i32
    return %c0_i32, %c0_i32_0 : i32, i32
  }
  func.func @transform_5(%arg0: i32) -> (i32, i32) {
    %c0_i32 = arith.constant 0 : i32
    %c0_i32_0 = arith.constant 0 : i32
    %c0_i32_1 = arith.constant 0 : i32
    return %c0_i32, %c0_i32_0 : i32, i32
  }
  func.func @transform_6(%arg0: i32) -> (i32, i32) {
    %c0_i32 = arith.constant 0 : i32
    %c0_i32_0 = arith.constant 0 : i32
    %c0_i32_1 = arith.constant 0 : i32
    return %c0_i32, %c0_i32_0 : i32, i32
  }
  func.func @transform_7(%arg0: i32) -> (i32, i32) {
    %c0_i32 = arith.constant 0 : i32
    %c0_i32_0 = arith.constant 0 : i32
    return %arg0, %c0_i32 : i32, i32
  }
}

</mosaic_0001>

<bundles_post_ra>
// kernel: tpu_custom_call.1
= control target key start
LH: loop header
LB: loop body
LE: loop exit
PB: predicated region body
PF: predicated region fallthrough
CT: control target
= control target key end

     0   :  { %vm64_vm0 = vcmask 130048   ;;  %v341_v0 = vmov 0.0   ;;  %vm342_vm1 = vmmov 0   ;;  %vm157_vm2 = vcmask 523264   ;;  %s440_s1 = inlined_call_operand.vmem [shape: bf16[64,16], index: 1, kind: input, shape index: {}]   ;;  %s441_s3 = inlined_call_operand.vmem [shape: bf16[64,64], index: 3, kind: input, shape index: {}]   ;;  %s442_s0 = inlined_call_operand.vmem [shape: f32[8,16], index: 0, kind: input, shape index: {}]   ;;  %s443_s5 = inlined_call_operand.vmem [shape: bf16[4,64], index: 5, kind: input, shape index: {}]   ;;  %s444_s2 = inlined_call_operand.vmem [shape: f32[1,64], index: 2, kind: input, shape index: {}]   ;;  %s445_s4 = inlined_call_operand.vmem [shape: f32[1,64], index: 4, kind: input, shape index: {}]   ;;  %s446_s6 = inlined_call_operand.vmem [shape: f32[1,4], index: 6, kind: input, shape index: {}]   ;;  %s447_s7 = inlined_call_operand.vmem [shape: f32[8,4], index: 7, kind: output, shape index: {}]  }
   0x1   :  { %301 = vmatprep.subr.bf16.mxu0 %v341_v0  ;;  %v333_v1 = vld [vmem:[%s440_s1] sm:$0xff]   ;;  %309 = vmatprep.mubr.msk.bf16.mxu0 %vm342_vm1, %v341_v0  ;;  %v334_v3 = vld [vmem:[%s440_s1 + $0x8] sm:$0xff]   ;;  %v335_v8 = vld [vmem:[%s440_s1 + $0x10] sm:$0xff]   ;;  %vm269_vm3 = vcmask 31744  }
   0x2   :  { %313 = vmatprep.subr.bf16.mxu1 %v341_v0  ;;  %321 = vmatprep.mubr.msk.bf16.mxu1 %vm342_vm1, %v341_v0  ;;  %v69_v2 = vsel %vm64_vm0, %v333_v1, 0  ;;  %v337_v4 = vld [vmem:[%s441_s3] sm:$0xff]   ;;  %v72_v6 = vsel %vm64_vm0, %v334_v3, 0  ;;  %v338_v7 = vld [vmem:[%s441_s3 + $0x8] sm:$0xff]   ;;  %v75_v10 = vsel %vm64_vm0, %v335_v8, 0  ;;  %v339_v11 = vld [vmem:[%s441_s3 + $0x10] sm:$0xff]  }
   0x3   :  { %302 = vmatpush3.bf16.xpose.msra.mxu0 %v69_v2  ;;  %v162_v5 = vsel %vm157_vm2, %v337_v4, 0  ;;  %v165_v9 = vsel %vm157_vm2, %v338_v7, 0  ;;  %v336_v12 = vld [vmem:[%s440_s1 + $0x18] sm:$0xff]   ;;  %v168_v13 = vsel %vm157_vm2, %v339_v11, 0  ;;  %v27_v15 = vld [vmem:[%s442_s0] sm:$0xff] }
   0x4   :  { %303 = vmatprep.subr.bf16.mxu0 %v341_v0  ;;  %314 = vmatpush3.bf16.xpose.msra.mxu1 %v162_v5  ;;  %v78_v14 = vsel %vm64_vm0, %v336_v12, 0  ;;  %v28_v16 = vpack.c.bf16 %v27_v15, %v27_v15  ;;  %v340_v17 = vld [vmem:[%s441_s3 + $0x18] sm:$0xff]   ;;  %v215_v19 = vld [vmem:[%s443_s5] sm:$0x3] }
   0x5   :  { %315 = vmatprep.subr.bf16.mxu1 %v341_v0  ;;  %v171_v18 = vsel %vm157_vm2, %v340_v17, 0  ;;  %v227_v20 = vsel %vm157_vm2, %v215_v19, 0  ;;  %v275_v21 = vld [vmem:[%s444_s2] ss:$0 sm:$0xff] }
   0x6   :  { %v281_v29 = vld [vmem:[%s445_s4] ss:$0 sm:$0xff] }
   0x7   :  { %v287_v37 = vld [vmem:[%s446_s6] ss:$0 sm:$0xff] }
   0xb   :  { %304 = vmatpush3.bf16.xpose.msra.mxu0 %v72_v6 }
   0xc   :  { %305 = vmatprep.subr.bf16.mxu0 %v341_v0  ;;  %316 = vmatpush3.bf16.xpose.msra.mxu1 %v165_v9 }
   0xd   :  { %317 = vmatprep.subr.bf16.mxu1 %v341_v0 }
  0x13   :  { %306 = vmatpush3.bf16.xpose.msra.mxu0 %v75_v10 }
  0x14   :  { %307 = vmatprep.subr.bf16.mxu0 %v341_v0  ;;  %318 = vmatpush3.bf16.xpose.msra.mxu1 %v168_v13 }
  0x15   :  { %319 = vmatprep.subr.bf16.mxu1 %v341_v0 }
  0x1b   :  { %308 = vmatpush3.bf16.xpose.msra.mxu0 %v78_v14 }
  0x1c   :  { %325 = vmatprep.subr.bf16.mxu0 %v341_v0  ;;  %320 = vmatpush3.bf16.xpose.msra.mxu1 %v171_v18 }
  0x22   :  { %310 = vmatmul.mubr.msk.bf16.vlgmr.msra.gmra.mrb[0].mxu0 %vm64_vm0, %v28_v16 }
  0x23   :  { %327 = vmatprep.mubr.msk.bf16.mxu0 %vm342_vm1, %v341_v0  ;;  %326 = vmatpush3.bf16.xpose.msra.mxu0 %v227_v20 }
  0xf5   :  { %v114_v22 = vpop.f32.mrb[0].mxu0 }
  0xf6   :  { %v115_v23 = vadd.f32 %v275_v21, %v114_v22  ;;  %v311_v24 = vpop.f32.mrb[1].mxu0 }
  0xf7   :  { %v117_v25 = vpop.f32.mrb[2].mxu0 }
  0xf8   :  { %v120_v26 = vmax.f32 %v115_v23, 0.0  ;;  %v312_v27 = vpop.f32.mrb[3].mxu0 }
  0xfa   :  { %v121_v28 = vpack.c.bf16 %v120_v26, %v120_v26 }
  0xfc   :  { %322 = vmatmul.mubr.msk.bf16.vlgmr.msra.gmra.mrb[0].mxu1 %vm157_vm2, %v121_v28 }
 0x1cf   :  { %v207_v30 = vpop.f32.mrb[0].mxu1 }
 0x1d0   :  { %v208_v31 = vadd.f32 %v281_v29, %v207_v30  ;;  %v323_v32 = vpop.f32.mrb[1].mxu1 }
 0x1d1   :  { %v210_v33 = vpop.f32.mrb[2].mxu1 }
 0x1d2   :  { %v213_v34 = vmax.f32 %v208_v31, 0.0  ;;  %v324_v35 = vpop.f32.mrb[3].mxu1 }
 0x1d4   :  { %v214_v36 = vpack.c.bf16 %v213_v34, %v213_v34 }
 0x1d6   :  { %328 = vmatmul.mubr.msk.bf16.vlgmr.msra.gmra.mrb[4].mxu0 %vm157_vm2, %v214_v36 }
 0x2a9   :  { %v263_v38 = vpop.f32.mrb[4].mxu0 }
 0x2aa   :  { %v264_v39 = vadd.f32 %v287_v37, %v263_v38  ;;  %v329_v40 = vpop.f32.mrb[5].mxu0 }
 0x2ab   :  { %v266_v41 = vpop.f32.mrb[6].mxu0 }
 0x2ac   :  { %270 = vst.msk [vmem:[%s447_s7] sm:$0xff] %vm269_vm3, %v264_v39  ;;  %v330_v42 = vpop.f32.mrb[7].mxu0 }

</bundles_post_ra>
